<compile_context>
chip_gen: v6e
topology: v6e:2x2x1
jax: 0.10.0
libtpu: 0.0.40
codegen_flags: <defaults>
</compile_context>

<pallas_src>
import functools
import math

import jax
import jax.numpy as jnp
from jax.experimental import pallas as pl
from jax.experimental.pallas import tpu as pltpu

LANE = 128   # lane width: all hidden/output feature dims (10, 8, 4, C) are zero-padded to 128
SUB = 8      # sublane granularity for the batch axis
TB_MAX = 1024  # batch tile (rows) — safe for v7x's 64 MiB VMEM, large enough to hit HBM roofline


def _leaky_relu(x, negative_slope=0.01):
    # matches torch.nn.functional.leaky_relu default slope
    return jnp.where(x > 0, x, negative_slope * x)


def _round_up(n, m):
    return ((n + m - 1) // m) * m


def mlp_kernel(x_ref,
               w1_ref, b1_ref,
               w2_ref, b2_ref,
               w3_ref, b3_ref,
               w4_ref, b4_ref,
               o_ref):
    """One batch tile of the full 4-layer MLP forward.

    x_ref : (TB, F_in)    f32   (un-padded input features)
    w1_ref: (F_in, 128)   f32   (layer-1 weights, VPU rank-1 path)
    w2/3/4: (128, 128)    bf16  (zero-padded, MXU path, f32 accumulation)
    b*    : (1, 128)      f32
    o_ref : (TB, 128)     f32
    """
    x = x_ref[...]                        # (TB, F_in) f32
    w1 = w1_ref[...]                      # (F_in, LANE) f32

    # ---- layer 1: K = F_in (tiny) -> rank-1 VPU updates, no 2->128 input padding ----
    h = jnp.zeros((x.shape[0], LANE), dtype=jnp.float32)
    for k in range(x.shape[1]):           # static, F_in is tiny (e.g. 2)
        h = h + x[:, k:k + 1] * w1[k:k + 1, :]
    h = _leaky_relu(h + b1_ref[...])

    # ---- layers 2-4: bf16 MXU matmuls, f32 accumulation, f32 bias/activation ----
    h = jnp.dot(h.astype(jnp.bfloat16), w2_ref[...],
                preferred_element_type=jnp.float32) + b2_ref[...]
    h = _leaky_relu(h)
    h = jnp.dot(h.astype(jnp.bfloat16), w3_ref[...],
                preferred_element_type=jnp.float32) + b3_ref[...]
    h = _leaky_relu(h)
    h = jnp.dot(h.astype(jnp.bfloat16), w4_ref[...],
                preferred_element_type=jnp.float32) + b4_ref[...]
    o_ref[...] = h.astype(o_ref.dtype)


def prepare_params(params):
    """One-time parameter prep (hoisted out of the forward, per perf feedback).

    PyTorch Linear weights are (out, in); store w.T zero-padded to TPU-friendly shapes:
      w1 -> (F_in, 128) f32   (VPU layer)
      w2..w4 -> (128, 128) bf16 (MXU layers)
      b* -> (1, 128) f32
    """
    def pad_bias(b):
        b = b.astype(jnp.float32)
        return jnp.pad(b, (0, LANE - b.shape[0])).reshape(1, LANE)

    w1 = params["w1"].astype(jnp.float32).T                       # (F_in, 10)
    w1 = jnp.pad(w1, ((0, 0), (0, LANE - w1.shape[1])))           # (F_in, 128)

    def pad_w_bf16(w):
        wt = w.astype(jnp.float32).T                              # (in, out)
        wt = jnp.pad(wt, ((0, LANE - wt.shape[0]), (0, LANE - wt.shape[1])))
        return wt.astype(jnp.bfloat16)

    return {
        "w1": w1, "b1": pad_bias(params["b1"]),
        "w2": pad_w_bf16(params["w2"]), "b2": pad_bias(params["b2"]),
        "w3": pad_w_bf16(params["w3"]), "b3": pad_bias(params["b3"]),
        "w4": pad_w_bf16(params["w4"]), "b4": pad_bias(params["b4"]),
    }


@functools.partial(jax.jit, static_argnames=("num_classes",))
def mlp_forward(x, prepped, num_classes=2):
    """x: (B, F_in) float32.  prepped: output of prepare_params()."""
    B, F_in = x.shape
    TB = TB_MAX if B >= TB_MAX else _round_up(B, SUB)
    Bp = _round_up(B, TB)
    xp = jnp.pad(x.astype(jnp.float32), ((0, Bp - B), (0, 0)))    # pad batch only, not features

    grid = (Bp // TB,)
    const2d = lambda i: (0, 0)          # weights/biases: VMEM-resident across grid steps
    batch2d = lambda i: (i, 0)          # activations: tiled along the batch axis

    w_spec = pl.BlockSpec((LANE, LANE), const2d)
    b_spec = pl.BlockSpec((1, LANE), const2d)

    out_padded = pl.pallas_call(
        mlp_kernel,
        out_shape=jax.ShapeDtypeStruct((Bp, LANE), jnp.float32),
        grid=grid,
        in_specs=[
            pl.BlockSpec((TB, F_in), batch2d),       # x (full, un-padded feature dim)
            pl.BlockSpec((F_in, LANE), const2d),     # w1
            b_spec,                                  # b1
            w_spec, b_spec,                          # w2, b2
            w_spec, b_spec,                          # w3, b3
            w_spec, b_spec,                          # w4, b4
        ],
        out_specs=pl.BlockSpec((TB, LANE), batch2d),
        compiler_params=pltpu.CompilerParams(
            dimension_semantics=("parallel",),       # shard batch axis across v7x's 2 TCs
            vmem_limit_bytes=32 * 1024 * 1024,       # explicit; safe on v5e/v6e/v7x
        ),
    )(xp,
      prepped["w1"], prepped["b1"],
      prepped["w2"], prepped["b2"],
      prepped["w3"], prepped["b3"],
      prepped["w4"], prepped["b4"])

    return out_padded[:B, :num_classes]


def init_params(key, input_class=2, num_classes=2):
    """Deterministic parameter init mirroring the PyTorch module's __init__."""
    dims = [(10, input_class), (8, 10), (4, 8), (num_classes, 4)]
    keys = jax.random.split(key, 8)
    params = {}

    def kaiming_normal(k, shape):
        # mode='fan_in', nonlinearity='leaky_relu' (a=0.01 default in torch.nn.init)
        fan_in = shape[1]
        gain = math.sqrt(2.0 / (1.0 + 0.01 ** 2))
        std = gain / math.sqrt(fan_in)
        return std * jax.random.normal(k, shape, dtype=jnp.float32)

    def xavier_uniform(k, shape):
        fan_out, fan_in = shape
        bound = math.sqrt(6.0 / (fan_in + fan_out))
        return jax.random.uniform(k, shape, minval=-bound, maxval=bound, dtype=jnp.float32)

    def linear_bias(k, fan_in, fan_out):
        # PyTorch nn.Linear default bias init: U(-1/sqrt(fan_in), 1/sqrt(fan_in))
        bound = 1.0 / math.sqrt(fan_in)
        return jax.random.uniform(k, (fan_out,), minval=-bound, maxval=bound, dtype=jnp.float32)

    for i, (out_f, in_f) in enumerate(dims, start=1):
        wk, bk = keys[2 * (i - 1)], keys[2 * (i - 1) + 1]
        w = kaiming_normal(wk, (out_f, in_f)) if i < 4 else xavier_uniform(wk, (out_f, in_f))
        params[f"w{i}"] = w
        params[f"b{i}"] = linear_bias(bk, in_f, out_f)
    return params


def _ref_f32(x, p):
    """Pure-JAX f32 reference of the PyTorch forward."""
    h = x.astype(jnp.float32)
    for i in range(1, 4):
        h = h @ p[f"w{i}"].T + p[f"b{i}"]
        h = jnp.where(h > 0, h, 0.01 * h)
    return h @ p["w4"].T + p["b4"]


def _ref_bf16(x, p):
    """Pure-JAX reference mirroring the kernel's precision scheme (bf16 MXU, f32 acc)."""
    h = x.astype(jnp.float32)
    h = h @ p["w1"].astype(jnp.float32).T + p["b1"]
    h = jnp.where(h > 0, h, 0.01 * h)
    for i in (2, 3, 4):
        w = p[f"w{i}"].astype(jnp.bfloat16)
        h = jnp.dot(h.astype(jnp.bfloat16), w.T,
                    preferred_element_type=jnp.float32) + p[f"b{i}"]
        if i < 4:
            h = jnp.where(h > 0, h, 0.01 * h)
    return h


if __name__ == "__main__":
    key = jax.random.PRNGKey(0)
    pkey, xkey = jax.random.split(key)

    input_class, num_classes = 2, 2
    params = init_params(pkey, input_class=input_class, num_classes=num_classes)
    prepped = prepare_params(params)   # one-time prep (transpose / pad / bf16 cast)

    # Two batch sizes: tiny (single tile) and one that exercises the batch grid + row padding.
    for B in (8, 2065):
        xk, xkey = jax.random.split(xkey)
        x = jax.random.normal(xk, (B, input_class), dtype=jnp.float32)

        out = mlp_forward(x, prepped, num_classes=num_classes)
        jax.block_until_ready(out)
        assert out.shape == (B, num_classes)

        # Tight check against a reference that mirrors the kernel's bf16/f32 scheme.
        expected_bf16 = _ref_bf16(x, params)
        assert jnp.allclose(out, expected_bf16, atol=2e-3, rtol=2e-3), (
            f"mismatch vs bf16-mirroring reference at B={B}")

        # Loose check against the exact f32 PyTorch-equivalent forward (bf16 rounding slack).
        expected_f32 = _ref_f32(x, params)
        assert jnp.allclose(out, expected_f32, atol=1e-1, rtol=1e-1), (
            f"mismatch vs f32 reference at B={B}")

    print("KERNEL_OK")
</pallas_src>

<mosaic_0001>
module attributes {stable_mosaic.version = 11 : i64} {
  func.func @mlp_kernel(%arg0: i32, %arg1: memref<8x2xf32, #tpu.memory_space<vmem>>, %arg2: memref<2x128xf32, #tpu.memory_space<vmem>>, %arg3: memref<1x128xf32, #tpu.memory_space<vmem>>, %arg4: memref<128x128xbf16, #tpu.memory_space<vmem>>, %arg5: memref<1x128xf32, #tpu.memory_space<vmem>>, %arg6: memref<128x128xbf16, #tpu.memory_space<vmem>>, %arg7: memref<1x128xf32, #tpu.memory_space<vmem>>, %arg8: memref<128x128xbf16, #tpu.memory_space<vmem>>, %arg9: memref<1x128xf32, #tpu.memory_space<vmem>>, %arg10: memref<8x128xf32, #tpu.memory_space<vmem>>) attributes {dimension_semantics = [#tpu.dimension_semantics<parallel>], iteration_bounds = array<i64: 1>, scalar_prefetch = 0 : i64, scratch_operands = 0 : i64, tpu.core_type = #tpu.core_type<tc>, window_params = [{transform_indices = @transform_0, window_bounds = array<i64: 8, 2>}, {pipeline_mode = #tpu.pipeline_mode<synchronous>, transform_indices = @transform_1, window_bounds = array<i64: 2, 128>}, {pipeline_mode = #tpu.pipeline_mode<synchronous>, transform_indices = @transform_2, window_bounds = array<i64: 1, 128>}, {pipeline_mode = #tpu.pipeline_mode<synchronous>, transform_indices = @transform_3, window_bounds = array<i64: 128, 128>}, {pipeline_mode = #tpu.pipeline_mode<synchronous>, transform_indices = @transform_4, window_bounds = array<i64: 1, 128>}, {pipeline_mode = #tpu.pipeline_mode<synchronous>, transform_indices = @transform_5, window_bounds = array<i64: 128, 128>}, {pipeline_mode = #tpu.pipeline_mode<synchronous>, transform_indices = @transform_6, window_bounds = array<i64: 1, 128>}, {pipeline_mode = #tpu.pipeline_mode<synchronous>, transform_indices = @transform_7, window_bounds = array<i64: 128, 128>}, {pipeline_mode = #tpu.pipeline_mode<synchronous>, transform_indices = @transform_8, window_bounds = array<i64: 1, 128>}, {transform_indices = @transform_9, window_bounds = array<i64: 8, 128>}]} {
    %c0 = arith.constant 0 : index
    %c0_0 = arith.constant 0 : index
    %0 = vector.load %arg1[%c0, %c0_0] : memref<8x2xf32, #tpu.memory_space<vmem>>, vector<8x2xf32>
    %c0_1 = arith.constant 0 : index
    %c0_2 = arith.constant 0 : index
    %1 = vector.load %arg2[%c0_1, %c0_2] : memref<2x128xf32, #tpu.memory_space<vmem>>, vector<2x128xf32>
    %cst = arith.constant 0.000000e+00 : f32
    %2 = vector.broadcast %cst : f32 to vector<8x128xf32>
    %3 = vector.extract_strided_slice %0 {offsets = [0, 0], sizes = [8, 1], strides = [1, 1]} : vector<8x2xf32> to vector<8x1xf32>
    %4 = vector.extract_strided_slice %1 {offsets = [0, 0], sizes = [1, 128], strides = [1, 1]} : vector<2x128xf32> to vector<1x128xf32>
    %5 = vector.broadcast %3 : vector<8x1xf32> to vector<8x128xf32>
    %6 = vector.broadcast %4 : vector<1x128xf32> to vector<8x128xf32>
    %7 = arith.mulf %5, %6 : vector<8x128xf32>
    %8 = arith.addf %2, %7 : vector<8x128xf32>
    %9 = vector.extract_strided_slice %0 {offsets = [0, 1], sizes = [8, 1], strides = [1, 1]} : vector<8x2xf32> to vector<8x1xf32>
    %10 = vector.extract_strided_slice %1 {offsets = [1, 0], sizes = [1, 128], strides = [1, 1]} : vector<2x128xf32> to vector<1x128xf32>
    %11 = vector.broadcast %9 : vector<8x1xf32> to vector<8x128xf32>
    %12 = vector.broadcast %10 : vector<1x128xf32> to vector<8x128xf32>
    %13 = arith.mulf %11, %12 : vector<8x128xf32>
    %14 = arith.addf %8, %13 : vector<8x128xf32>
    %c0_3 = arith.constant 0 : index
    %c0_4 = arith.constant 0 : index
    %15 = vector.load %arg3[%c0_3, %c0_4] : memref<1x128xf32, #tpu.memory_space<vmem>>, vector<1x128xf32>
    %16 = vector.broadcast %15 : vector<1x128xf32> to vector<8x128xf32>
    %17 = arith.addf %14, %16 : vector<8x128xf32>
    %cst_5 = arith.constant 0.000000e+00 : f32
    %18 = vector.broadcast %cst_5 : f32 to vector<8x128xf32>
    %19 = arith.cmpf ogt, %17, %18 : vector<8x128xf32>
    %cst_6 = arith.constant 0.00999999977 : f32
    %20 = vector.broadcast %cst_6 : f32 to vector<8x128xf32>
    %21 = arith.mulf %20, %17 : vector<8x128xf32>
    %22 = arith.select %19, %17, %21 : vector<8x128xi1>, vector<8x128xf32>
    %23 = arith.truncf %22 : vector<8x128xf32> to vector<8x128xbf16>
    %c0_7 = arith.constant 0 : index
    %c0_8 = arith.constant 0 : index
    %24 = vector.load %arg4[%c0_7, %c0_8] : memref<128x128xbf16, #tpu.memory_space<vmem>>, vector<128x128xbf16>
    %cst_9 = arith.constant dense<0.000000e+00> : vector<8x128xf32>
    %25 = tpu.matmul %23, %24, %cst_9 {dimension_numbers = #tpu.dot_dimension_numbers<[1], [0], [0], [1], [0, 0, 1, 1], [], []>} : vector<8x128xbf16>, vector<128x128xbf16>, vector<8x128xf32> -> vector<8x128xf32>
    %c0_10 = arith.constant 0 : index
    %c0_11 = arith.constant 0 : index
    %26 = vector.load %arg5[%c0_10, %c0_11] : memref<1x128xf32, #tpu.memory_space<vmem>>, vector<1x128xf32>
    %27 = vector.broadcast %26 : vector<1x128xf32> to vector<8x128xf32>
    %28 = arith.addf %25, %27 : vector<8x128xf32>
    %cst_12 = arith.constant 0.000000e+00 : f32
    %29 = vector.broadcast %cst_12 : f32 to vector<8x128xf32>
    %30 = arith.cmpf ogt, %28, %29 : vector<8x128xf32>
    %cst_13 = arith.constant 0.00999999977 : f32
    %31 = vector.broadcast %cst_13 : f32 to vector<8x128xf32>
    %32 = arith.mulf %31, %28 : vector<8x128xf32>
    %33 = arith.select %30, %28, %32 : vector<8x128xi1>, vector<8x128xf32>
    %34 = arith.truncf %33 : vector<8x128xf32> to vector<8x128xbf16>
    %c0_14 = arith.constant 0 : index
    %c0_15 = arith.constant 0 : index
    %35 = vector.load %arg6[%c0_14, %c0_15] : memref<128x128xbf16, #tpu.memory_space<vmem>>, vector<128x128xbf16>
    %cst_16 = arith.constant dense<0.000000e+00> : vector<8x128xf32>
    %36 = tpu.matmul %34, %35, %cst_16 {dimension_numbers = #tpu.dot_dimension_numbers<[1], [0], [0], [1], [0, 0, 1, 1], [], []>} : vector<8x128xbf16>, vector<128x128xbf16>, vector<8x128xf32> -> vector<8x128xf32>
    %c0_17 = arith.constant 0 : index
    %c0_18 = arith.constant 0 : index
    %37 = vector.load %arg7[%c0_17, %c0_18] : memref<1x128xf32, #tpu.memory_space<vmem>>, vector<1x128xf32>
    %38 = vector.broadcast %37 : vector<1x128xf32> to vector<8x128xf32>
    %39 = arith.addf %36, %38 : vector<8x128xf32>
    %cst_19 = arith.constant 0.000000e+00 : f32
    %40 = vector.broadcast %cst_19 : f32 to vector<8x128xf32>
    %41 = arith.cmpf ogt, %39, %40 : vector<8x128xf32>
    %cst_20 = arith.constant 0.00999999977 : f32
    %42 = vector.broadcast %cst_20 : f32 to vector<8x128xf32>
    %43 = arith.mulf %42, %39 : vector<8x128xf32>
    %44 = arith.select %41, %39, %43 : vector<8x128xi1>, vector<8x128xf32>
    %45 = arith.truncf %44 : vector<8x128xf32> to vector<8x128xbf16>
    %c0_21 = arith.constant 0 : index
    %c0_22 = arith.constant 0 : index
    %46 = vector.load %arg8[%c0_21, %c0_22] : memref<128x128xbf16, #tpu.memory_space<vmem>>, vector<128x128xbf16>
    %cst_23 = arith.constant dense<0.000000e+00> : vector<8x128xf32>
    %47 = tpu.matmul %45, %46, %cst_23 {dimension_numbers = #tpu.dot_dimension_numbers<[1], [0], [0], [1], [0, 0, 1, 1], [], []>} : vector<8x128xbf16>, vector<128x128xbf16>, vector<8x128xf32> -> vector<8x128xf32>
    %c0_24 = arith.constant 0 : index
    %c0_25 = arith.constant 0 : index
    %48 = vector.load %arg9[%c0_24, %c0_25] : memref<1x128xf32, #tpu.memory_space<vmem>>, vector<1x128xf32>
    %49 = vector.broadcast %48 : vector<1x128xf32> to vector<8x128xf32>
    %50 = arith.addf %47, %49 : vector<8x128xf32>
    %c0_26 = arith.constant 0 : index
    %c0_27 = arith.constant 0 : index
    %51 = vector.load %arg10[%c0_26, %c0_27] : memref<8x128xf32, #tpu.memory_space<vmem>>, vector<8x128xf32>
    tpu.vector_store %arg10[%c0_26, %c0_27], %50 {strides = array<i32>} : memref<8x128xf32, #tpu.memory_space<vmem>>, vector<8x128xf32>,
    return
  }
  func.func @transform_0(%arg0: i32) -> (i32, i32) {
    %c0_i32 = arith.constant 0 : i32
    %c0_i32_0 = arith.constant 0 : i32
    return %arg0, %c0_i32 : i32, i32
  }
  func.func @transform_1(%arg0: i32) -> (i32, i32) {
    %c0_i32 = arith.constant 0 : i32
    %c0_i32_0 = arith.constant 0 : i32
    %c0_i32_1 = arith.constant 0 : i32
    return %c0_i32, %c0_i32_0 : i32, i32
  }
  func.func @transform_2(%arg0: i32) -> (i32, i32) {
    %c0_i32 = arith.constant 0 : i32
    %c0_i32_0 = arith.constant 0 : i32
    %c0_i32_1 = arith.constant 0 : i32
    return %c0_i32, %c0_i32_0 : i32, i32
  }
  func.func @transform_3(%arg0: i32) -> (i32, i32) {
    %c0_i32 = arith.constant 0 : i32
    %c0_i32_0 = arith.constant 0 : i32
    %c0_i32_1 = arith.constant 0 : i32
    return %c0_i32, %c0_i32_0 : i32, i32
  }
  func.func @transform_4(%arg0: i32) -> (i32, i32) {
    %c0_i32 = arith.constant 0 : i32
    %c0_i32_0 = arith.constant 0 : i32
    %c0_i32_1 = arith.constant 0 : i32
    return %c0_i32, %c0_i32_0 : i32, i32
  }
  func.func @transform_5(%arg0: i32) -> (i32, i32) {
    %c0_i32 = arith.constant 0 : i32
    %c0_i32_0 = arith.constant 0 : i32
    %c0_i32_1 = arith.constant 0 : i32
    return %c0_i32, %c0_i32_0 : i32, i32
  }
  func.func @transform_6(%arg0: i32) -> (i32, i32) {
    %c0_i32 = arith.constant 0 : i32
    %c0_i32_0 = arith.constant 0 : i32
    %c0_i32_1 = arith.constant 0 : i32
    return %c0_i32, %c0_i32_0 : i32, i32
  }
  func.func @transform_7(%arg0: i32) -> (i32, i32) {
    %c0_i32 = arith.constant 0 : i32
    %c0_i32_0 = arith.constant 0 : i32
    %c0_i32_1 = arith.constant 0 : i32
    return %c0_i32, %c0_i32_0 : i32, i32
  }
  func.func @transform_8(%arg0: i32) -> (i32, i32) {
    %c0_i32 = arith.constant 0 : i32
    %c0_i32_0 = arith.constant 0 : i32
    %c0_i32_1 = arith.constant 0 : i32
    return %c0_i32, %c0_i32_0 : i32, i32
  }
  func.func @transform_9(%arg0: i32) -> (i32, i32) {
    %c0_i32 = arith.constant 0 : i32
    %c0_i32_0 = arith.constant 0 : i32
    return %arg0, %c0_i32 : i32, i32
  }
}

</mosaic_0001>

<bundles_post_ra>
// kernel: mlp_forward.1
= control target key start
LH: loop header
LB: loop body
LE: loop exit
PB: predicated region body
PF: predicated region fallthrough
CT: control target
= control target key end

     0   :  { %14 = vsyncpa [#allocation3], 0  ;;  %s790_s0 = inlined_call_operand.vmem [shape: f32[8,2], index: 0, kind: input, shape index: {}]   ;;  %s791_s1 = inlined_call_operand.vmem [shape: f32[2,128], index: 1, kind: input, shape index: {}]   ;;  %s792_s2 = inlined_call_operand.vmem [shape: f32[1,128], index: 2, kind: input, shape index: {}]   ;;  %s793_s3 = inlined_call_operand.hbm [shape: bf16[128,128], index: 3, kind: input, shape index: {}]   ;;  %s794_s4 = inlined_call_operand.vmem [shape: f32[1,128], index: 4, kind: input, shape index: {}]   ;;  %s795_s5 = inlined_call_operand.hbm [shape: bf16[128,128], index: 5, kind: input, shape index: {}]   ;;  %s796_s6 = inlined_call_operand.vmem [shape: f32[1,128], index: 6, kind: input, shape index: {}]   ;;  %s797_s7 = inlined_call_operand.hbm [shape: bf16[128,128], index: 7, kind: input, shape index: {}]   ;;  %s798_s8 = inlined_call_operand.vmem [shape: f32[1,128], index: 8, kind: input, shape index: {}]   ;;  %s799_s9 = inlined_call_operand.vmem [shape: f32[8,128], index: 9, kind: output, shape index: {}]  }
   0x1   :  { %15 = vsyncpa [#allocation5], 0  ;;  %s671_s30 = smov [#allocation4]   ;;  %s672_s11 = smov [#allocation2]  }
   0x2   :  { %s41_s10 = sshll.u32 %s671_s30, 4  ;;  %s27_s12 = sshll.u32 %s672_s11, 4  ;;  %s42_s10 = int_to_ptr.vmem [resolvable:$true] %s41_s10  ;;  %s28_s12 = int_to_ptr.vmem [resolvable:$true] %s27_s12 }
   0x3   :  { %s615_s13 = scalar_lea.vmem %s42_s10, 1024  ;;  %p620_p1 = scmp.lt.s32.totalorder %s42_s10, %s42_s10 }
   0x4   :  { %p616_p0 = scmp.ne.s32.totalorder %s42_s10, %s615_s13  ;;  %p621_p2 = scmp.lt.s32.totalorder %s615_s13, %s615_s13 }
   0x6   :  { %p622_p3 = por %p621_p2, %p620_p1 }
   0x8   :  { %p623_p4 = pnand %p622_p3, %p616_p0 }
   0xa   :  { %626 = shalt.err (!%p623_p4)
}
   0xb   :  { %s673_s14 = smov 64   ;;  %s674_s15 = smov 4  }
   0xc   :  { %47 = dma.hbm_to_vmem [thread:$0]  %s795_s5, 1024, %s42_s10, [#allocation5], %s673_s14, %s673_s14, %s674_s15  }
   0xd   :  { %s635_s18 = scalar_lea.vmem %s28_s12, 1024  ;;  %p640_p6 = scmp.lt.s32.totalorder %s28_s12, %s28_s12 }
   0xe   :  { %p636_p5 = scmp.ne.s32.totalorder %s28_s12, %s635_s18  ;;  %p641_p7 = scmp.lt.s32.totalorder %s635_s18, %s635_s18 }
  0x10   :  { %p642_p8 = por %p641_p7, %p640_p6 }
  0x12   :  { %p643_p9 = pnand %p642_p8, %p636_p5 }
  0x14   :  { %646 = shalt.err (!%p643_p9)
}
  0x15   :  { %33 = dma.hbm_to_vmem [thread:$0]  %s793_s3, 1024, %s28_s12, [#allocation3], %s673_s14, %s673_s14, %s674_s15  }
  0x16   :  { %s675_s21 = smov [#allocation6]  }
  0x17   :  { %s55_s22 = sshll.u32 %s675_s21, 4  ;;  %s56_s22 = int_to_ptr.vmem [resolvable:$true] %s55_s22 }
  0x18   :  { %s655_s23 = scalar_lea.vmem %s56_s22, 1024  ;;  %p660_p11 = scmp.lt.s32.totalorder %s56_s22, %s56_s22 }
  0x19   :  { %p656_p10 = scmp.ne.s32.totalorder %s56_s22, %s655_s23  ;;  %p661_p12 = scmp.lt.s32.totalorder %s655_s23, %s655_s23 }
  0x1b   :  { %p662_p13 = por %p661_p12, %p660_p11 }
  0x1d   :  { %p663_p0 = pnand %p662_p13, %p656_p10 }
  0x1f   :  { %666 = shalt.err (!%p663_p0)
}
  0x20   :  { %61 = dma.hbm_to_vmem [thread:$0]  %s797_s7, 1024, %s56_s22, [#allocation5], %s673_s14, %s673_s14, %s674_s15  }
  0x21   :  { %667 = dma.done.wait [#allocation3], 1024  }
  0x22   :  { %668 = vsyncadd [#allocation3], 4294966272 }
  0x23   :  { %669 = dma.done.wait [#allocation5], 2048  }
  0x24   :  { %670 = vsyncadd [#allocation5], 4294965248  ;;  %v676_v0 = vmov 0   ;;  %v677_v1 = vmov 0.0   ;;  %v74_v2 = vld [vmem:[%s790_s0] sm:$0xff]  ;;  %v583_v3 = vld [vmem:[#allocation2 + $0x38] sm:$0xff]   ;;  %v81_v18 = vlaneseq }
  0x25   :  { %581 = vset.pattern.permute.xlu0 %v676_v0  ;;  %512 = vmatprep.subr.bf16.mxu0 %v677_v1  ;;  %v584_v4 = vld [vmem:[#allocation2 + $0x30] sm:$0xff]   ;;  %v678_v5 = vmov 1   ;;  %v585_v6 = vld [vmem:[#allocation2 + $0x28] sm:$0xff]   ;;  %vm679_vm0 = vmmov 0   ;;  %v586_v7 = vld [vmem:[#allocation2 + $0x20] sm:$0xff]  }
  0x26   :  { %532 = vmatprep.subr.bf16.mxu1 %v677_v1  ;;  %78 = vperm.xlu0 %581, %v74_v2   ;;  %v591_v8 = vld [vmem:[#allocation4 + $0x38] sm:$0xff]   ;;  %v592_v10 = vld [vmem:[#allocation4 + $0x30] sm:$0xff]   ;;  %v593_v12 = vld [vmem:[#allocation4 + $0x28] sm:$0xff]   ;;  %v82_v19 = vshrl.u32 %v81_v18, 7 }
  0x27   :  { %513 = vmatpush3.bf16.msra.mxu0 %v583_v3  ;;  %528 = vmatprep.mubr.msk.bf16.mxu0 %vm679_vm0, %v677_v1  ;;  %v587_v9 = vld [vmem:[#allocation2 + $0x18] sm:$0xff]   ;;  %v588_v11 = vld [vmem:[#allocation2 + $0x10] sm:$0xff]   ;;  %v589_v13 = vld [vmem:[#allocation2 + $0x8] sm:$0xff]  }
  0x28   :  { %514 = vmatprep.subr.bf16.mxu0 %v677_v1  ;;  %548 = vmatprep.mubr.msk.bf16.mxu1 %vm679_vm0, %v677_v1  ;;  %v594_v14 = vld [vmem:[#allocation4 + $0x20] sm:$0xff]   ;;  %v595_v16 = vld [vmem:[#allocation4 + $0x18] sm:$0xff]   ;;  %v596_v17 = vld [vmem:[#allocation4 + $0x10] sm:$0xff]   ;;  %v83_v20 = vsub.s32 0, %v82_v19  ;;  %v93_v21 = vsub.s32 1, %v82_v19 }
  0x29   :  { %533 = vmatpush3.bf16.msra.mxu1 %v591_v8  ;;  %v590_v15 = vld [vmem:[#allocation2] sm:$0xff]   ;;  %v597_v35 = vld [vmem:[#allocation4 + $0x8] sm:$0xff]   ;;  %v599_v37 = vld [vmem:[#allocation6 + $0x38] sm:$0xff]  }
  0x2a   :  { %582 = vset.pattern.permute.xlu0 %v678_v5  ;;  %534 = vmatprep.subr.bf16.mxu1 %v677_v1  ;;  %v75_v22 = vld [vmem:[%s791_s1] sm:$0x3]  ;;  %v600_v38 = vld [vmem:[#allocation6 + $0x30] sm:$0xff]   ;;  %v601_v39 = vld [vmem:[#allocation6 + $0x28] sm:$0xff]  }
  0x2b   :  { %88 = vperm.xlu0 %582, %v74_v2   ;;  %515 = vmatpush3.bf16.msra.mxu0 %v584_v4  ;;  %v84_v24 = vrot.slane %v75_v22, %v83_v20  ;;  %v94_v25 = vrot.slane %v75_v22, %v93_v21  ;;  %v457_v29 = vld [vmem:[%s792_s2] ss:$0 sm:$0xff]  ;;  %v603_v41 = vld [vmem:[#allocation6 + $0x18] sm:$0xff]   ;;  %v604_v42 = vld [vmem:[#allocation6 + $0x10] sm:$0xff]  }
  0x2c   :  { %516 = vmatprep.subr.bf16.mxu0 %v677_v1  ;;  %v598_v36 = vld [vmem:[#allocation4] sm:$0xff]   ;;  %v605_v52 = vld [vmem:[#allocation6 + $0x8] sm:$0xff]  }
  0x2d   :  { %535 = vmatpush3.bf16.msra.mxu1 %v592_v10  ;;  %v602_v40 = vld [vmem:[#allocation6 + $0x20] sm:$0xff]  }
  0x2e   :  { %536 = vmatprep.subr.bf16.mxu1 %v677_v1  ;;  %v458_v43 = vld [vmem:[%s794_s4] ss:$0 sm:$0xff] }
  0x2f   :  { %517 = vmatpush3.bf16.msra.mxu0 %v585_v6  ;;  %v606_v53 = vld [vmem:[#allocation6] sm:$0xff]  }
  0x30   :  { %518 = vmatprep.subr.bf16.mxu0 %v677_v1  ;;  %v467_v54 = vld [vmem:[%s796_s6] ss:$0 sm:$0xff] }
  0x31   :  { %537 = vmatpush3.bf16.msra.mxu1 %v593_v12  ;;  %v476_v63 = vld [vmem:[%s798_s8] ss:$0 sm:$0xff] }
  0x32   :  { %538 = vmatprep.subr.bf16.mxu1 %v677_v1 }
  0x33   :  { %519 = vmatpush3.bf16.msra.mxu0 %v586_v7 }
  0x34   :  { %520 = vmatprep.subr.bf16.mxu0 %v677_v1 }
  0x35   :  { %539 = vmatpush3.bf16.msra.mxu1 %v594_v14 }
  0x36   :  { %540 = vmatprep.subr.bf16.mxu1 %v677_v1 }
  0x37   :  { %521 = vmatpush3.bf16.msra.mxu0 %v587_v9 }
  0x38   :  { %522 = vmatprep.subr.bf16.mxu0 %v677_v1 }
  0x39   :  { %541 = vmatpush3.bf16.msra.mxu1 %v595_v16 }
  0x3a   :  { %542 = vmatprep.subr.bf16.mxu1 %v677_v1 }
  0x3b   :  { %523 = vmatpush3.bf16.msra.mxu0 %v588_v11 }
  0x3c   :  { %524 = vmatprep.subr.bf16.mxu0 %v677_v1 }
  0x3d   :  { %543 = vmatpush3.bf16.msra.mxu1 %v596_v17 }
  0x3e   :  { %544 = vmatprep.subr.bf16.mxu1 %v677_v1 }
  0x3f   :  { %525 = vmatpush3.bf16.msra.mxu0 %v589_v13 }
  0x40   :  { %526 = vmatprep.subr.bf16.mxu0 %v677_v1 }
  0x41   :  { %545 = vmatpush3.bf16.msra.mxu1 %v597_v35 }
  0x42   :  { %546 = vmatprep.subr.bf16.mxu1 %v677_v1 }
  0x43   :  { %527 = vmatpush3.bf16.msra.mxu0 %v590_v15 }
  0x44   :  { %552 = vmatprep.subr.bf16.mxu0 %v677_v1 }
  0x45   :  { %547 = vmatpush3.bf16.msra.mxu1 %v598_v36 }
  0xa1   :  { %v79_v23 = vpop.permute.xlu0 %78 }
  0xa2   :  { %v85_v27 = vmul.f32 %v84_v24, %v79_v23 }
  0xa6   :  { %v89_v26 = vpop.permute.xlu0 %88 }
  0xa7   :  { %v95_v28 = vmul.f32 %v94_v25, %v89_v26 }
  0xa9   :  { %v96_v30 = vadd.f32 %v95_v28, %v85_v27 }
  0xab   :  { %v104_v31 = vadd.f32 %v457_v29, %v96_v30 }
  0xad   :  { %vm105_vm1 = vcmp.gt.f32.partialorder %v104_v31, 0.0  ;;  %v106_v32 = vmul.f32 0.01, %v104_v31 }
  0xaf   :  { %v107_v33 = vsel %vm105_vm1, %v104_v31, %v106_v32 }
  0xb0   :  { %v108_v34 = vpack.c.bf16 %v107_v33, %v107_v33 }
  0xb2   :  { %529 = vmatmul.mubr.bf16.vlgmr.msra.gmra.mxu0 %v108_v34 }
  0xb3   :  { %568 = vmatprep.mubr.msk.bf16.mxu0 %vm679_vm0, %v677_v1  ;;  %553 = vmatpush3.bf16.msra.mxu0 %v599_v37 }
  0xb4   :  { %554 = vmatprep.subr.bf16.mxu0 %v677_v1 }
  0xb7   :  { %555 = vmatpush3.bf16.msra.mxu0 %v600_v38 }
  0xb8   :  { %556 = vmatprep.subr.bf16.mxu0 %v677_v1 }
  0xbb   :  { %557 = vmatpush3.bf16.msra.mxu0 %v601_v39 }
  0xbc   :  { %558 = vmatprep.subr.bf16.mxu0 %v677_v1 }
  0xbf   :  { %559 = vmatpush3.bf16.msra.mxu0 %v602_v40 }
  0xc0   :  { %560 = vmatprep.subr.bf16.mxu0 %v677_v1 }
  0xc3   :  { %561 = vmatpush3.bf16.msra.mxu0 %v603_v41 }
  0xc4   :  { %562 = vmatprep.subr.bf16.mxu0 %v677_v1 }
  0xc7   :  { %563 = vmatpush3.bf16.msra.mxu0 %v604_v42 }
  0xc8   :  { %564 = vmatprep.subr.bf16.mxu0 %v677_v1 }
  0xcb   :  { %565 = vmatpush3.bf16.msra.mxu0 %v605_v52 }
  0xcc   :  { %566 = vmatprep.subr.bf16.mxu0 %v677_v1 }
  0xcf   :  { %567 = vmatpush3.bf16.msra.mxu0 %v606_v53 }
 0x172   :  { %v214_v44 = vpop.f32.mrf.mxu0 }
 0x173   :  { %v215_v45 = vadd.f32 %v458_v43, %v214_v44 }
 0x174   :  { %v530_v46 = vpop.f32.mrf.mxu0 }
 0x175   :  { %vm220_vm2 = vcmp.gt.f32.partialorder %v215_v45, 0.0  ;;  %v221_v47 = vmul.f32 0.01, %v215_v45 }
 0x176   :  { %v217_v48 = vpop.f32.mrf.mxu0 }
 0x177   :  { %v222_v49 = vsel %vm220_vm2, %v215_v45, %v221_v47 }
 0x178   :  { %v531_v50 = vpop.f32.mrf.mxu0  ;;  %v223_v51 = vpack.c.bf16 %v222_v49, %v222_v49 }
 0x17a   :  { %549 = vmatmul.mubr.bf16.vlgmr.msra.gmra.mxu1 %v223_v51 }
 0x23a   :  { %v329_v55 = vpop.f32.mrf.mxu1 }
 0x23b   :  { %v330_v56 = vadd.f32 %v467_v54, %v329_v55 }
 0x23c   :  { %v550_v57 = vpop.f32.mrf.mxu1 }
 0x23d   :  { %vm335_vm3 = vcmp.gt.f32.partialorder %v330_v56, 0.0  ;;  %v336_v58 = vmul.f32 0.01, %v330_v56 }
 0x23e   :  { %v332_v59 = vpop.f32.mrf.mxu1 }
 0x23f   :  { %v337_v60 = vsel %vm335_vm3, %v330_v56, %v336_v58 }
 0x240   :  { %v338_v61 = vpack.c.bf16 %v337_v60, %v337_v60  ;;  %v551_v62 = vpop.f32.mrf.mxu1 }
 0x242   :  { %569 = vmatmul.mubr.bf16.vlgmr.msra.gmra.mxu0 %v338_v61 }
 0x302   :  { %v444_v0 = vpop.f32.mrf.mxu0 }
 0x303   :  { %v445_v1 = vadd.f32 %v476_v63, %v444_v0 }
 0x304   :  { %v570_v2 = vpop.f32.mrf.mxu0 }
 0x305   :  { %450 = vst [vmem:[%s799_s9] sm:$0xff] %v445_v1 }
 0x306   :  { %v447_v3 = vpop.f32.mrf.mxu0 }
 0x308   :  { %v571_v4 = vpop.f32.mrf.mxu0 }
 0x309   :  { %455 = vsyncpa [#allocation3], 1 }
 0x30a   :  { %456 = vsyncpa [#allocation5], 1 }

</bundles_post_ra>
